<compile_context>
chip_gen: v7x
topology: tpu7x:2x2x1
jax: 0.10.0
libtpu: 0.0.40
codegen_flags: <defaults>
</compile_context>

<pallas_src>
import functools

import jax
import jax.numpy as jnp
from jax.experimental import pallas as pl
from jax.experimental.pallas import tpu as pltpu


def _round_up(v, m):
    return (v + m - 1) // m * m


def _resblock_kernel(x_ref, w1_ref, s1_ref, t1_ref, w2_ref, s2_ref, t2_ref,
                     wadj_ref, o_ref, *, K, P, Lt, Le8, L_real, Nb, c_in,
                     c_out_p):
    """One (batch-block, L-tile) step.  x_ref holds the haloed im2col tile."""
    Kc = K * c_in
    Me = Nb * Le8          # rows incl. halo (conv1 / BN1 / ELU computed here)
    M = Nb * Lt            # output rows of this tile

    x = x_ref[...]                                          # (Nb, Le8, Kc) bf16

    # ---- conv1: single im2col matmul, contraction K*c_in, f32 accumulation ----
    h = jnp.dot(x.reshape(Me, Kc), w1_ref[...],
                preferred_element_type=jnp.float32)          # (Me, c_out_p)

    # ---- BN1 (folded scale/shift, conv1 bias folded in) + ELU(alpha=1) ----
    h = h * s1_ref[...] + t1_ref[...]
    h = jnp.where(h > 0, h, jnp.exp(h) - 1.0)
    # Dropout: identity at inference time.
    # TODO(synk): training-mode dropout RNG / batch-statistics BatchNorm not
    # reproduced (inference semantics used).

    # ---- zero h outside the real sequence (conv2 zero-padding + L padding) ----
    h = h.reshape(Nb, Le8, c_out_p)
    pos = (pl.program_id(1) * Lt - P
           + jax.lax.broadcasted_iota(jnp.int32, (Nb, Le8, c_out_p), 1))
    h = jnp.where((pos >= 0) & (pos < L_real), h, 0.0)

    # ---- conv2: K accumulating per-tap dots on h held in registers ----
    acc = jnp.zeros((M, c_out_p), jnp.float32)
    for k in range(K):
        tap = h[:, k:k + Lt, :].astype(jnp.bfloat16).reshape(M, c_out_p)
        acc = acc + jnp.dot(tap, w2_ref[k], preferred_element_type=jnp.float32)

    # ---- BN2 (folded; conv2 bias and adjust bias folded into the shift) ----
    acc = acc * s2_ref[...] + t2_ref[...]

    # ---- residual path: 1x1 matmul (identity weights when c_in == c_out) ----
    xm = x[:, P:P + Lt, P * c_in:(P + 1) * c_in].reshape(M, c_in)
    acc = acc + jnp.dot(xm, wadj_ref[...], preferred_element_type=jnp.float32)

    out = jnp.where(acc > 0, acc, jnp.exp(acc) - 1.0)        # final ELU
    o_ref[...] = out.reshape(Nb, Lt, c_out_p).astype(o_ref.dtype)


def residual_block_forward(x_ncl, params, *, kernel_size, stride, padding):
    """x_ncl: (N, C_in, L) float32, PyTorch Conv1d layout.  Returns (N, C_out, L)."""
    assert stride == 1, "Pallas kernel implemented for stride == 1"
    assert 2 * padding == kernel_size - 1, "requires 'same'-style padding"
    N, c_in, L = x_ncl.shape
    K, P = kernel_size, padding
    c_out = params["w1"].shape[0]
    c_out_p = _round_up(max(c_out, 128), 128)     # lane-dense output channels
    has_adjust = c_in != c_out
    eps = 1e-5
    Kc = K * c_in

    # ---- L tiling (with K-1 halo) ----
    MAX_LT = 512
    Lt = min(MAX_LT, _round_up(L, 8))
    n_lt = -(-L // Lt)
    Lt = _round_up(-(-L // n_lt), 8)
    L_pad = n_lt * Lt
    Le = Lt + 2 * P                       # haloed tile length
    Le8 = _round_up(max(Le, 8), 8)        # sublane-aligned haloed tile length

    # ---- batch blocking: target ~512 matmul rows per grid step ----
    TARGET_ROWS = 512
    Nb = max(1, min(N, max(1, TARGET_ROWS // Lt)))
    N_pad = _round_up(N, Nb)

    def step_bytes(nb):                   # rough per-step VMEM footprint
        x_t = nb * Le8 * Kc * 2
        o_t = nb * Lt * c_out_p * 2
        w = (Kc * c_out_p + K * c_out_p * c_out_p + c_in * c_out_p) * 2
        sc = 4 * c_out_p * 4
        live = 4 * nb * Le8 * c_out_p * 4
        return 2 * (x_t + o_t) + 2 * (w + sc) + live

    VMEM_BUDGET = 40 << 20                # conservative for v7x (64 MiB phys)
    while Nb > 1 and step_bytes(Nb) > VMEM_BUDGET:
        Nb = max(1, Nb // 2)
        N_pad = _round_up(N, Nb)
    # keep >= 2 grid steps when possible so v7x's two TensorCores both work
    while Nb > 1 and (N_pad // Nb) * n_lt < 2:
        Nb = max(1, Nb // 2)
        N_pad = _round_up(N, Nb)
    vmem_limit = int(min(max(2 * step_bytes(Nb), 32 << 20), 48 << 20))

    # ---- fold BN (+ conv biases, + adjust bias) into per-channel scale/shift ----
    s1 = params["g1"] / jnp.sqrt(params["rv1"] + eps)
    t1 = params["be1"] + (params["b1"] - params["rm1"]) * s1
    s2 = params["g2"] / jnp.sqrt(params["rv2"] + eps)
    t2 = params["be2"] + (params["b2"] - params["rm2"]) * s2
    if has_adjust:
        t2 = t2 + params["badj"]

    def pad_c(v):                         # (c_out,) -> (1, c_out_p)
        return jnp.pad(v.astype(jnp.float32),
                       (0, c_out_p - c_out)).reshape(1, c_out_p)

    s1p, t1p, s2p, t2p = pad_c(s1), pad_c(t1), pad_c(s2), pad_c(t2)

    # conv1 weights: (Cout, Cin, K) -> im2col form (K*Cin, Coutp), bf16
    w1k = jnp.transpose(params["w1"], (2, 1, 0)).reshape(Kc, c_out)
    w1k = jnp.pad(w1k, ((0, 0), (0, c_out_p - c_out))).astype(jnp.bfloat16)
    # conv2 weights: (Cout, Cout, K) -> (K, Coutp, Coutp), bf16
    w2k = jnp.transpose(params["w2"], (2, 1, 0))
    w2k = jnp.pad(w2k, ((0, 0), (0, c_out_p - c_out),
                        (0, c_out_p - c_out))).astype(jnp.bfloat16)
    # 1x1 channel-adjust weights (identity when Cin == Cout), bf16
    if has_adjust:
        wadj = params["wadj"][:, :, 0].T                     # (Cin, Cout)
    else:
        wadj = jnp.eye(c_in, dtype=jnp.float32)
    wadj = jnp.pad(wadj, ((0, 0), (0, c_out_p - wadj.shape[1]))).astype(jnp.bfloat16)

    # ---- layout glue: NCL -> NLC, im2col, per-L-tile haloed blocks (bf16) ----
    x_nlc = jnp.transpose(x_ncl, (0, 2, 1))
    x_seq = jnp.pad(x_nlc, ((0, N_pad - N), (P, P + (L_pad - L)), (0, 0)))
    x_seq = x_seq.astype(jnp.bfloat16)                       # (N_pad, L_pad+2P, Cin)
    x_cols = jnp.concatenate([x_seq[:, k:k + L_pad, :] for k in range(K)],
                             axis=-1)                        # (N_pad, L_pad, K*Cin)
    x_cols = jnp.pad(x_cols, ((0, 0), (P, Le8 - P - Lt), (0, 0)))
    x_tiles = jnp.stack([x_cols[:, t * Lt:t * Lt + Le8, :] for t in range(n_lt)],
                        axis=1)                              # (N_pad, n_lt, Le8, K*Cin)

    kern = functools.partial(_resblock_kernel, K=K, P=P, Lt=Lt, Le8=Le8,
                             L_real=L, Nb=Nb, c_in=c_in, c_out_p=c_out_p)

    # Constant-index weight/scale specs could be single-buffered via
    # pipeline_mode=pl.Buffered(1); left default-buffered for compile safety.
    out_nlc = pl.pallas_call(
        kern,
        out_shape=jax.ShapeDtypeStruct((N_pad, L_pad, c_out_p), jnp.bfloat16),
        grid_spec=pltpu.PrefetchScalarGridSpec(
            num_scalar_prefetch=0,
            grid=(N_pad // Nb, n_lt),
            in_specs=[
                pl.BlockSpec((Nb, None, Le8, Kc), lambda n, t: (n, t, 0, 0)),  # x tile
                pl.BlockSpec((Kc, c_out_p), lambda n, t: (0, 0)),              # w1
                pl.BlockSpec((1, c_out_p), lambda n, t: (0, 0)),               # bn1 scale
                pl.BlockSpec((1, c_out_p), lambda n, t: (0, 0)),               # bn1 shift
                pl.BlockSpec((K, c_out_p, c_out_p), lambda n, t: (0, 0, 0)),   # w2
                pl.BlockSpec((1, c_out_p), lambda n, t: (0, 0)),               # bn2 scale
                pl.BlockSpec((1, c_out_p), lambda n, t: (0, 0)),               # bn2 shift
                pl.BlockSpec((c_in, c_out_p), lambda n, t: (0, 0)),            # w_adjust
            ],
            out_specs=pl.BlockSpec((Nb, Lt, c_out_p), lambda n, t: (n, t, 0)),
        ),
        compiler_params=pltpu.CompilerParams(
            dimension_semantics=("parallel", "parallel"),
            vmem_limit_bytes=vmem_limit),
    )(x_tiles, w1k, s1p, t1p, w2k, s2p, t2p, wadj)

    out = out_nlc[:N, :L, :c_out].astype(jnp.float32)
    return jnp.transpose(out, (0, 2, 1))


# ---------- pure-JAX reference (mirrors the PyTorch module in eval mode) ----------
def _ref_forward(x_ncl, params, kernel_size, stride, padding):
    eps = 1e-5

    def conv1d(x, w, b, s, p):
        y = jax.lax.conv_general_dilated(
            x, w, window_strides=(s,), padding=[(p, p)],
            dimension_numbers=("NCH", "OIH", "NCH"))
        return y + b[None, :, None]

    def bn(x, g, be, rm, rv):
        return (x - rm[None, :, None]) / jnp.sqrt(rv[None, :, None] + eps) \
               * g[None, :, None] + be[None, :, None]

    out = conv1d(x_ncl, params["w1"], params["b1"], stride, padding)
    out = jax.nn.elu(bn(out, params["g1"], params["be1"], params["rm1"], params["rv1"]))
    out = conv1d(out, params["w2"], params["b2"], stride, padding)
    out = bn(out, params["g2"], params["be2"], params["rm2"], params["rv2"])
    if "wadj" in params:
        res = conv1d(x_ncl, params["wadj"], params["badj"], stride, 0)
    else:
        res = x_ncl
    return jax.nn.elu(out + res)


if __name__ == "__main__":
    N, C_IN, C_OUT, L = 2, 4, 8, 16
    K, STRIDE, PAD = 3, 1, 1

    key = jax.random.PRNGKey(0)
    ks = jax.random.split(key, 12)
    params = {
        "w1": 0.2 * jax.random.normal(ks[0], (C_OUT, C_IN, K), jnp.float32),
        "b1": 0.1 * jax.random.normal(ks[1], (C_OUT,), jnp.float32),
        "w2": 0.2 * jax.random.normal(ks[2], (C_OUT, C_OUT, K), jnp.float32),
        "b2": 0.1 * jax.random.normal(ks[3], (C_OUT,), jnp.float32),
        "g1": 1.0 + 0.1 * jax.random.normal(ks[4], (C_OUT,), jnp.float32),
        "be1": 0.1 * jax.random.normal(ks[5], (C_OUT,), jnp.float32),
        "rm1": jnp.zeros((C_OUT,), jnp.float32),
        "rv1": jnp.ones((C_OUT,), jnp.float32),
        "g2": 1.0 + 0.1 * jax.random.normal(ks[6], (C_OUT,), jnp.float32),
        "be2": 0.1 * jax.random.normal(ks[7], (C_OUT,), jnp.float32),
        "rm2": jnp.zeros((C_OUT,), jnp.float32),
        "rv2": jnp.ones((C_OUT,), jnp.float32),
        "wadj": 0.2 * jax.random.normal(ks[8], (C_OUT, C_IN, 1), jnp.float32),
        "badj": 0.1 * jax.random.normal(ks[9], (C_OUT,), jnp.float32),
    }
    x = jax.random.normal(ks[10], (N, C_IN, L), jnp.float32)

    out = residual_block_forward(x, params, kernel_size=K, stride=STRIDE, padding=PAD)
    out = jax.block_until_ready(out)

    ref = _ref_forward(x, params, K, STRIDE, PAD)
    assert out.shape == (N, C_OUT, L), out.shape
    # bf16 MXU inputs + bf16 output stream (f32 accumulation) -> loose tolerance.
    assert jnp.allclose(out, ref, atol=4e-2, rtol=4e-2), \
        float(jnp.max(jnp.abs(out - ref)))
    print("KERNEL_OK")
</pallas_src>

<mosaic_0001>
module attributes {stable_mosaic.version = 11 : i64} {
  func.func @_resblock_kernel(%arg0: i32, %arg1: i32, %arg2: memref<1x1x24x12xbf16, #tpu.memory_space<vmem>>, %arg3: memref<12x128xbf16, #tpu.memory_space<vmem>>, %arg4: memref<1x128xf32, #tpu.memory_space<vmem>>, %arg5: memref<1x128xf32, #tpu.memory_space<vmem>>, %arg6: memref<3x128x128xbf16, #tpu.memory_space<vmem>>, %arg7: memref<1x128xf32, #tpu.memory_space<vmem>>, %arg8: memref<1x128xf32, #tpu.memory_space<vmem>>, %arg9: memref<4x128xbf16, #tpu.memory_space<vmem>>, %arg10: memref<1x16x128xbf16, #tpu.memory_space<vmem>>) attributes {dimension_semantics = [#tpu.dimension_semantics<parallel>, #tpu.dimension_semantics<parallel>], iteration_bounds = array<i64: 2, 1>, scalar_prefetch = 0 : i64, scratch_operands = 0 : i64, tpu.core_type = #tpu.core_type<tc>, window_params = [{transform_indices = @transform_0, window_bounds = array<i64: 1, 1, 24, 12>}, {pipeline_mode = #tpu.pipeline_mode<synchronous>, transform_indices = @transform_1, window_bounds = array<i64: 12, 128>}, {pipeline_mode = #tpu.pipeline_mode<synchronous>, transform_indices = @transform_2, window_bounds = array<i64: 1, 128>}, {pipeline_mode = #tpu.pipeline_mode<synchronous>, transform_indices = @transform_3, window_bounds = array<i64: 1, 128>}, {pipeline_mode = #tpu.pipeline_mode<synchronous>, transform_indices = @transform_4, window_bounds = array<i64: 3, 128, 128>}, {pipeline_mode = #tpu.pipeline_mode<synchronous>, transform_indices = @transform_5, window_bounds = array<i64: 1, 128>}, {pipeline_mode = #tpu.pipeline_mode<synchronous>, transform_indices = @transform_6, window_bounds = array<i64: 1, 128>}, {pipeline_mode = #tpu.pipeline_mode<synchronous>, transform_indices = @transform_7, window_bounds = array<i64: 4, 128>}, {transform_indices = @transform_8, window_bounds = array<i64: 1, 16, 128>}]} {
    %c0 = arith.constant 0 : index
    %c0_0 = arith.constant 0 : index
    %c0_1 = arith.constant 0 : index
    %c0_2 = arith.constant 0 : index
    %0 = vector.load %arg2[%c0, %c0_0, %c0_1, %c0_2] : memref<1x1x24x12xbf16, #tpu.memory_space<vmem>>, vector<1x1x24x12xbf16>
    %1 = vector.shape_cast %0 : vector<1x1x24x12xbf16> to vector<1x24x12xbf16>
    %2 = vector.shape_cast %1 : vector<1x24x12xbf16> to vector<24x12xbf16>
    %c0_3 = arith.constant 0 : index
    %c0_4 = arith.constant 0 : index
    %3 = vector.load %arg3[%c0_3, %c0_4] : memref<12x128xbf16, #tpu.memory_space<vmem>>, vector<12x128xbf16>
    %cst = arith.constant dense<0.000000e+00> : vector<24x128xf32>
    %4 = tpu.matmul %2, %3, %cst {dimension_numbers = #tpu.dot_dimension_numbers<[1], [0], [0], [1], [0, 0, 1, 1], [], []>} : vector<24x12xbf16>, vector<12x128xbf16>, vector<24x128xf32> -> vector<24x128xf32>
    %c0_5 = arith.constant 0 : index
    %c0_6 = arith.constant 0 : index
    %5 = vector.load %arg4[%c0_5, %c0_6] : memref<1x128xf32, #tpu.memory_space<vmem>>, vector<1x128xf32>
    %6 = vector.broadcast %5 : vector<1x128xf32> to vector<24x128xf32>
    %7 = arith.mulf %4, %6 : vector<24x128xf32>
    %c0_7 = arith.constant 0 : index
    %c0_8 = arith.constant 0 : index
    %8 = vector.load %arg5[%c0_7, %c0_8] : memref<1x128xf32, #tpu.memory_space<vmem>>, vector<1x128xf32>
    %9 = vector.broadcast %8 : vector<1x128xf32> to vector<24x128xf32>
    %10 = arith.addf %7, %9 : vector<24x128xf32>
    %cst_9 = arith.constant 0.000000e+00 : f32
    %11 = vector.broadcast %cst_9 : f32 to vector<24x128xf32>
    %12 = arith.cmpf ogt, %10, %11 : vector<24x128xf32>
    %13 = math.exp %10 : vector<24x128xf32>
    %cst_10 = arith.constant 1.000000e+00 : f32
    %14 = vector.broadcast %cst_10 : f32 to vector<24x128xf32>
    %15 = arith.subf %13, %14 : vector<24x128xf32>
    %16 = arith.select %12, %10, %15 : vector<24x128xi1>, vector<24x128xf32>
    %17 = vector.shape_cast %16 : vector<24x128xf32> to vector<1x24x128xf32>
    %c16_i32 = arith.constant 16 : i32
    %18 = arith.muli %arg1, %c16_i32 : i32
    %c1_i32 = arith.constant 1 : i32
    %19 = arith.subi %18, %c1_i32 : i32
    %20 = tpu.iota {dimensions = array<i32: 1>} : vector<1x24x128xi32>
    %21 = vector.broadcast %19 : i32 to vector<1x24x128xi32>
    %22 = arith.addi %21, %20 : vector<1x24x128xi32>
    %c0_i32 = arith.constant 0 : i32
    %23 = vector.broadcast %c0_i32 : i32 to vector<1x24x128xi32>
    %24 = arith.cmpi sge, %22, %23 : vector<1x24x128xi32>
    %c16_i32_11 = arith.constant 16 : i32
    %25 = vector.broadcast %c16_i32_11 : i32 to vector<1x24x128xi32>
    %26 = arith.cmpi slt, %22, %25 : vector<1x24x128xi32>
    %27 = arith.andi %24, %26 : vector<1x24x128xi1>
    %cst_12 = arith.constant 0.000000e+00 : f32
    %28 = vector.broadcast %cst_12 : f32 to vector<1x24x128xf32>
    %29 = arith.select %27, %17, %28 : vector<1x24x128xi1>, vector<1x24x128xf32>
    %cst_13 = arith.constant 0.000000e+00 : f32
    %30 = vector.broadcast %cst_13 : f32 to vector<16x128xf32>
    %31 = vector.extract_strided_slice %29 {offsets = [0, 0, 0], sizes = [1, 16, 128], strides = [1, 1, 1]} : vector<1x24x128xf32> to vector<1x16x128xf32>
    %32 = arith.truncf %31 : vector<1x16x128xf32> to vector<1x16x128xbf16>
    %33 = vector.shape_cast %32 : vector<1x16x128xbf16> to vector<16x128xbf16>
    %c0_14 = arith.constant 0 : index
    %c0_15 = arith.constant 0 : index
    %c0_16 = arith.constant 0 : index
    %34 = vector.load %arg6[%c0_14, %c0_15, %c0_16] : memref<3x128x128xbf16, #tpu.memory_space<vmem>>, vector<1x128x128xbf16>
    %35 = vector.shape_cast %34 : vector<1x128x128xbf16> to vector<128x128xbf16>
    %cst_17 = arith.constant dense<0.000000e+00> : vector<16x128xf32>
    %36 = tpu.matmul %33, %35, %cst_17 {dimension_numbers = #tpu.dot_dimension_numbers<[1], [0], [0], [1], [0, 0, 1, 1], [], []>} : vector<16x128xbf16>, vector<128x128xbf16>, vector<16x128xf32> -> vector<16x128xf32>
    %37 = arith.addf %30, %36 : vector<16x128xf32>
    %38 = vector.extract_strided_slice %29 {offsets = [0, 1, 0], sizes = [1, 16, 128], strides = [1, 1, 1]} : vector<1x24x128xf32> to vector<1x16x128xf32>
    %39 = arith.truncf %38 : vector<1x16x128xf32> to vector<1x16x128xbf16>
    %40 = vector.shape_cast %39 : vector<1x16x128xbf16> to vector<16x128xbf16>
    %c1 = arith.constant 1 : index
    %c0_18 = arith.constant 0 : index
    %c0_19 = arith.constant 0 : index
    %41 = vector.load %arg6[%c1, %c0_18, %c0_19] : memref<3x128x128xbf16, #tpu.memory_space<vmem>>, vector<1x128x128xbf16>
    %42 = vector.shape_cast %41 : vector<1x128x128xbf16> to vector<128x128xbf16>
    %cst_20 = arith.constant dense<0.000000e+00> : vector<16x128xf32>
    %43 = tpu.matmul %40, %42, %cst_20 {dimension_numbers = #tpu.dot_dimension_numbers<[1], [0], [0], [1], [0, 0, 1, 1], [], []>} : vector<16x128xbf16>, vector<128x128xbf16>, vector<16x128xf32> -> vector<16x128xf32>
    %44 = arith.addf %37, %43 : vector<16x128xf32>
    %45 = vector.extract_strided_slice %29 {offsets = [0, 2, 0], sizes = [1, 16, 128], strides = [1, 1, 1]} : vector<1x24x128xf32> to vector<1x16x128xf32>
    %46 = arith.truncf %45 : vector<1x16x128xf32> to vector<1x16x128xbf16>
    %47 = vector.shape_cast %46 : vector<1x16x128xbf16> to vector<16x128xbf16>
    %c2 = arith.constant 2 : index
    %c0_21 = arith.constant 0 : index
    %c0_22 = arith.constant 0 : index
    %48 = vector.load %arg6[%c2, %c0_21, %c0_22] : memref<3x128x128xbf16, #tpu.memory_space<vmem>>, vector<1x128x128xbf16>
    %49 = vector.shape_cast %48 : vector<1x128x128xbf16> to vector<128x128xbf16>
    %cst_23 = arith.constant dense<0.000000e+00> : vector<16x128xf32>
    %50 = tpu.matmul %47, %49, %cst_23 {dimension_numbers = #tpu.dot_dimension_numbers<[1], [0], [0], [1], [0, 0, 1, 1], [], []>} : vector<16x128xbf16>, vector<128x128xbf16>, vector<16x128xf32> -> vector<16x128xf32>
    %51 = arith.addf %44, %50 : vector<16x128xf32>
    %c0_24 = arith.constant 0 : index
    %c0_25 = arith.constant 0 : index
    %52 = vector.load %arg7[%c0_24, %c0_25] : memref<1x128xf32, #tpu.memory_space<vmem>>, vector<1x128xf32>
    %53 = vector.broadcast %52 : vector<1x128xf32> to vector<16x128xf32>
    %54 = arith.mulf %51, %53 : vector<16x128xf32>
    %c0_26 = arith.constant 0 : index
    %c0_27 = arith.constant 0 : index
    %55 = vector.load %arg8[%c0_26, %c0_27] : memref<1x128xf32, #tpu.memory_space<vmem>>, vector<1x128xf32>
    %56 = vector.broadcast %55 : vector<1x128xf32> to vector<16x128xf32>
    %57 = arith.addf %54, %56 : vector<16x128xf32>
    %58 = vector.extract_strided_slice %1 {offsets = [0, 1, 4], sizes = [1, 16, 4], strides = [1, 1, 1]} : vector<1x24x12xbf16> to vector<1x16x4xbf16>
    %59 = vector.shape_cast %58 : vector<1x16x4xbf16> to vector<16x4xbf16>
    %c0_28 = arith.constant 0 : index
    %c0_29 = arith.constant 0 : index
    %60 = vector.load %arg9[%c0_28, %c0_29] : memref<4x128xbf16, #tpu.memory_space<vmem>>, vector<4x128xbf16>
    %cst_30 = arith.constant dense<0.000000e+00> : vector<16x128xf32>
    %61 = tpu.matmul %59, %60, %cst_30 {dimension_numbers = #tpu.dot_dimension_numbers<[1], [0], [0], [1], [0, 0, 1, 1], [], []>} : vector<16x4xbf16>, vector<4x128xbf16>, vector<16x128xf32> -> vector<16x128xf32>
    %62 = arith.addf %57, %61 : vector<16x128xf32>
    %cst_31 = arith.constant 0.000000e+00 : f32
    %63 = vector.broadcast %cst_31 : f32 to vector<16x128xf32>
    %64 = arith.cmpf ogt, %62, %63 : vector<16x128xf32>
    %65 = math.exp %62 : vector<16x128xf32>
    %cst_32 = arith.constant 1.000000e+00 : f32
    %66 = vector.broadcast %cst_32 : f32 to vector<16x128xf32>
    %67 = arith.subf %65, %66 : vector<16x128xf32>
    %68 = arith.select %64, %62, %67 : vector<16x128xi1>, vector<16x128xf32>
    %69 = vector.shape_cast %68 : vector<16x128xf32> to vector<1x16x128xf32>
    %70 = arith.truncf %69 : vector<1x16x128xf32> to vector<1x16x128xbf16>
    %c0_33 = arith.constant 0 : index
    %c0_34 = arith.constant 0 : index
    %c0_35 = arith.constant 0 : index
    %71 = vector.load %arg10[%c0_33, %c0_34, %c0_35] : memref<1x16x128xbf16, #tpu.memory_space<vmem>>, vector<1x16x128xbf16>
    tpu.vector_store %arg10[%c0_33, %c0_34, %c0_35], %70 {strides = array<i32>} : memref<1x16x128xbf16, #tpu.memory_space<vmem>>, vector<1x16x128xbf16>,
    return
  }
  func.func @transform_0(%arg0: i32, %arg1: i32) -> (i32, i32, i32, i32) {
    %c0_i32 = arith.constant 0 : i32
    %c0_i32_0 = arith.constant 0 : i32
    %c0_i32_1 = arith.constant 0 : i32
    return %arg0, %arg1, %c0_i32, %c0_i32_0 : i32, i32, i32, i32
  }
  func.func @transform_1(%arg0: i32, %arg1: i32) -> (i32, i32) {
    %c0_i32 = arith.constant 0 : i32
    %c0_i32_0 = arith.constant 0 : i32
    %c0_i32_1 = arith.constant 0 : i32
    return %c0_i32, %c0_i32_0 : i32, i32
  }
  func.func @transform_2(%arg0: i32, %arg1: i32) -> (i32, i32) {
    %c0_i32 = arith.constant 0 : i32
    %c0_i32_0 = arith.constant 0 : i32
    %c0_i32_1 = arith.constant 0 : i32
    return %c0_i32, %c0_i32_0 : i32, i32
  }
  func.func @transform_3(%arg0: i32, %arg1: i32) -> (i32, i32) {
    %c0_i32 = arith.constant 0 : i32
    %c0_i32_0 = arith.constant 0 : i32
    %c0_i32_1 = arith.constant 0 : i32
    return %c0_i32, %c0_i32_0 : i32, i32
  }
  func.func @transform_4(%arg0: i32, %arg1: i32) -> (i32, i32, i32) {
    %c0_i32 = arith.constant 0 : i32
    %c0_i32_0 = arith.constant 0 : i32
    %c0_i32_1 = arith.constant 0 : i32
    %c0_i32_2 = arith.constant 0 : i32
    return %c0_i32, %c0_i32_0, %c0_i32_1 : i32, i32, i32
  }
  func.func @transform_5(%arg0: i32, %arg1: i32) -> (i32, i32) {
    %c0_i32 = arith.constant 0 : i32
    %c0_i32_0 = arith.constant 0 : i32
    %c0_i32_1 = arith.constant 0 : i32
    return %c0_i32, %c0_i32_0 : i32, i32
  }
  func.func @transform_6(%arg0: i32, %arg1: i32) -> (i32, i32) {
    %c0_i32 = arith.constant 0 : i32
    %c0_i32_0 = arith.constant 0 : i32
    %c0_i32_1 = arith.constant 0 : i32
    return %c0_i32, %c0_i32_0 : i32, i32
  }
  func.func @transform_7(%arg0: i32, %arg1: i32) -> (i32, i32) {
    %c0_i32 = arith.constant 0 : i32
    %c0_i32_0 = arith.constant 0 : i32
    %c0_i32_1 = arith.constant 0 : i32
    return %c0_i32, %c0_i32_0 : i32, i32
  }
  func.func @transform_8(%arg0: i32, %arg1: i32) -> (i32, i32, i32) {
    %c0_i32 = arith.constant 0 : i32
    %c0_i32_0 = arith.constant 0 : i32
    return %arg0, %arg1, %c0_i32 : i32, i32, i32
  }
}

</mosaic_0001>

<bundles_post_ra>
// kernel: tpu_custom_call.1
= control target key start
LH: loop header
LB: loop body
LE: loop exit
PB: predicated region body
PF: predicated region fallthrough
CT: control target
= control target key end

     0   :  { %13 = vsyncpa [#allocation3], 0  ;;  %s1701_s0 = inlined_call_operand.vmem [shape: bf16[2,1,24,12], index: 0, kind: input, shape index: {}]   ;;  %s1702_s1 = inlined_call_operand.vmem [shape: bf16[12,128], index: 1, kind: input, shape index: {}]   ;;  %s1703_s2 = inlined_call_operand.vmem [shape: f32[1,128], index: 2, kind: input, shape index: {}]   ;;  %s1704_s3 = inlined_call_operand.vmem [shape: f32[1,128], index: 3, kind: input, shape index: {}]   ;;  %s1705_s4 = inlined_call_operand.hbm [shape: bf16[3,128,128], index: 4, kind: input, shape index: {}]   ;;  %s1706_s5 = inlined_call_operand.vmem [shape: f32[1,128], index: 5, kind: input, shape index: {}]   ;;  %s1707_s6 = inlined_call_operand.vmem [shape: f32[1,128], index: 6, kind: input, shape index: {}]   ;;  %s1708_s7 = inlined_call_operand.vmem [shape: bf16[4,128], index: 7, kind: input, shape index: {}]   ;;  %s1709_s8 = inlined_call_operand.hbm [shape: bf16[2,16,128], index: 8, kind: output, shape index: {}]  }
   0x1   :  { %14 = vsyncpa [#allocation4], 0 }
   0x2   :  { %16 = vsyncpa [#allocation4 + $0x1], 0  ;;  %s1493_s27 = smov 0   ;;  %s1495_s28 = smov 0  }
   0x3   :  { %s1497_s29 = smov 0   ;;  %s1499_s30 = smov 0  }
   0x4   :  { %s1501_s9 = smov 0   ;;  %s1503_s10 = smov 0  }
   0x5 LB: > { %s1037_s11 = sadd.s32 4294967295, %s1436_s10   ;;  %s1038_s12 = sadd.s32 4294967294, %s1436_s10   ;;  %s1436_s10 = sphi %s1503_s10, %s22_s10   ;;  %s1432_s9 = sphi %s1501_s9, %s1727_s9   ;;  %s1428_s30 = sphi %s1499_s30, %s1726_s30   ;;  %s1424_s29 = sphi %s1497_s29, %s1725_s29   ;;  %s1420_s28 = sphi %s1495_s28, %s1724_s28   ;;  %s1416_s27 = sphi %s1493_s27, %s1723_s27  }
   0x6   : > { %s34_s13 = sadd.s32 1, %s1432_s9  ;;  %s218_s14 = sadd.s32 1, %s1424_s29 }
   0x7   : > { %p36_p0 = scmp.ge.s32.totalorder %s34_s13, 2  ;;  %p228_p1 = scmp.ne.s32.totalorder %s1424_s29, %s1420_s28 }
   0x8   : > { %p229_p2 = scmp.eq.s32.totalorder %s1037_s11, 1  ;;  %p234_p3 = scmp.ne.s32.totalorder %s1420_s28, %s1416_s27 }
   0x9   : > { %s1729_s13 = smov (%p36_p0, %s34_s13), 0  ;;  %p235_p5 = scmp.eq.s32.totalorder %s1038_s12, 1 }
   0xa   : > { %p1533_p4 = por %p229_p2, %p228_p1  ;;  %s213_s16 = ssub.s32 %s1432_s9, %s1729_s13 }
   0xb   : > { %p1039_p6 = scmp.ge.s32.totalorder %s1436_s10, 1  ;;  %p216_p7 = scmp.eq.s32.totalorder %s213_s16, 0 }
   0xc   : > { %s1714_s15 = scalar_select %p1533_p4, 1, 0 }
   0xd   : > { %p1540_p8 = por %p235_p5, %p234_p3  ;;  %p242_p9 = scmp.lt.s32.totalorder %s1436_s10, 3 }
   0xe   : > { %s1546_s18 = scalar_select %p216_p7, %s1424_s29, %s218_s14  }
   0xf   : > { %s1715_s17 = scalar_select %p1540_p8, 1, 0 }
  0x10   : > { %p1548_p10 = pnand %p1039_p6, %p242_p9  ;;  %p1552_p11 = scmp.eq.s32.totalorder %s1037_s11, 0 }
  0x11   : > { %s1438_s21 = smov [#allocation2]   ;;  %s1326_s26 = scalar_lea.hbm %s1705_s4, 3072 }
  0x12   : > { %s1716_s19 = scalar_select %p1548_p10, 1, 0 }
  0x13   : > { %s1717_s20 = scalar_select %p1552_p11, 1, 0 }
  0x14   : > { %p1221_p12 = pneg %p1548_p10  ;;  %s263_s22 = sshll.u32 %s1438_s21, 4  ;;  %s264_s22 = int_to_ptr.vmem [resolvable:$true] %s263_s22 }
  0x15   : > { %p1327_p0 = scmp.ne.s32.totalorder %s1705_s4, %s1326_s26  ;;  %p1333_p5 = scmp.lt.u32.totalorder %s1326_s26, %s1705_s4 }
  0x16   : > { %p1560_p13 = pnand %p1552_p11, %p1221_p12 }
  0x18   : > { %p1328_p1 = pneg %p1560_p13 }
  0x1a   : > { %p1329_p2 = pnand %p1328_p1, %p1327_p0 }
  0x1c   : > { %p1330_p3 = pneg %p1329_p2 }
  0x1e   : > { %p1335_p6 = pnand %p1333_p5, %p1330_p3 }
  0x20   : > { %1338 = shalt.err (!%p1335_p6)
}
  0x21   : > { %s1339_s21 = scalar_lea.vmem %s264_s22, 3072  ;;  %p1347_p8 = scmp.lt.s32.totalorder %s264_s22, %s264_s22 }
  0x22   : > { %p1340_p7 = scmp.ne.s32.totalorder %s264_s22, %s1339_s21  ;;  %p1348_p4 = scmp.lt.s32.totalorder %s1339_s21, %s1339_s21 }
  0x24   : > { %p1342_p9 = pnand %p1340_p7, %p1328_p1  ;;  %p1349_p11 = por %p1348_p4, %p1347_p8 }
  0x26   : > { %p1343_p12 = pneg %p1342_p9 }
  0x28   : > { %p1350_p10 = pnand %p1349_p11, %p1343_p12 }
  0x2a   : > { %1353 = shalt.err (!%p1350_p10)
}
  0x2b   : > { %s1439_s24 = smov 64   ;;  %s1440_s25 = smov 4  }
  0x2c   : > { %1224 = dma.hbm_to_vmem [thread:$0]  (!%p1560_p13), %s1705_s4, 3072, %s264_s22, [#allocation3], %s1439_s24, %s1439_s24, %s1440_s25  }
  0x2d   : > { %p1719_p0 = scmp.ne.s32.totalorder %s1716_s19, 0 }
  0x2e   : > { %p1720_p2 = scmp.ne.s32.totalorder (!%p1719_p0), %s1717_s20, 0 }
  0x2f   : > { %300 = sbr.rel (%p1719_p0) target bundleno = 588 (0x24c), region = 52 }
  0x36   : > { %1407 = dma.done.wait (%p1720_p2), [#allocation3], 3072  }
  0x37   : > { %1409 = vsyncadd (%p1720_p2), [#allocation3], 4294964224  ;;  %p338_p4 = scmp.lt.s32.totalorder %s1428_s30, 1  ;;  %v1441_v0 = vmov 0.0   ;;  %vm374_vm0 = vcmask 1045504   ;;  %vm367_vm1 = vcmask 97280   ;;  %v463_v35 = vlaneseq }
  0x38   : > { %1161 = vmatprep.subr.bf16.mxu1 %v1441_v0  ;;  %vm518_vm2 = vsmask.f32 7424  ;;  %v1289_v1 = vld [vmem:[%s1702_s1] sm:$0x3f]   ;;  %v1293_v9 = vld [vmem:[#allocation2 + $0x8] sm:$0xff]   ;;  %s1442_s20 = smov 124  }
  0x39   : > { %s339_s26 = scalar_select %p338_p4, %s1428_s30, 1  ;;  %1213 = vmatprep.subr.msk.bf16.mxu0 %vm374_vm0, %v1289_v1  ;;  %v376_v3 = vsel %vm374_vm0, %v1289_v1, 0  ;;  %v1292_v5 = vld [vmem:[#allocation2] sm:$0xff]   ;;  %v1295_v15 = vld [vmem:[#allocation2 + $0x10] sm:$0xff]   ;;  %v1296_v16 = vld [vmem:[#allocation2 + $0x48] sm:$0xff]   ;;  %vm1443_vm3 = vmmov 0  }
  0x3a   : > { %1136 = vmatpush3.bf16.msra.mxu0 %v376_v3  ;;  %1162 = vmatpush3.bf16.msra.mxu1 %v1292_v5  ;;  %v1294_v14 = vld [vmem:[#allocation2 + $0x40] sm:$0xff]   ;;  %v1297_v17 = vld [vmem:[#allocation2 + $0x18] sm:$0xff]   ;;  %v1298_v18 = vld [vmem:[#allocation2 + $0x50] sm:$0xff]   ;;  %v464_v43 = vshrl.u32 %v463_v35, 7  ;;  %vm1444_vm9 = vmmov 1   ;;  %vm729_vm11 = vcmask 1046528  }
  0x3b   : > { %s1214_s23 = smul.u32 12, %s339_s26  ;;  %1141 = vmatprep.subr.bf16.mxu0 %v1441_v0  ;;  %1163 = vmatprep.subr.bf16.mxu1 %v1441_v0  ;;  %v1299_v19 = vld [vmem:[#allocation2 + $0x20] sm:$0xff]   ;;  %v1300_v20 = vld [vmem:[#allocation2 + $0x58] sm:$0xff]   ;;  %v1301_v21 = vld [vmem:[#allocation2 + $0x28] sm:$0xff]   ;;  %vm860_vm12 = vcmask 1041408   ;;  %vm856_vm13 = vcmask 31744  }
  0x3c   : > { %v1302_v22 = vld [vmem:[#allocation2 + $0x60] sm:$0xff]   ;;  %v1303_v23 = vld [vmem:[#allocation2 + $0x30] sm:$0xff]   ;;  %v1304_v24 = vld [vmem:[#allocation2 + $0x68] sm:$0xff]   ;;  %1177 = vmatprep.mubr.msk.bf16.mxu1 %vm1443_vm3, %v1441_v0  ;;  %v466_v45 = vadd.s32 16, %v464_v43  ;;  %v468_v47 = vadd.s32 4294967295, %v464_v43  ;;  %s335_s21 = sand.u32 1, %s1420_s28  }
  0x3d   : > { %s346_s19 = scalar_lea.vmem %s1701_s0, %s1214_s23  ;;  %v1305_v25 = vld [vmem:[#allocation2 + $0x38] sm:$0xff]   ;;  %v1306_v26 = vld [vmem:[#allocation2 + $0x70] sm:$0xff]   ;;  %v1051_v28 = vld [vmem:[%s1703_s2] ss:$0 sm:$0xff]  ;;  %s1097_s24 = sshll.u32 %s1428_s30, 7 }
  0x3e   : > { %v1290_v2 = vld [vmem:[%s346_s19] sm:$0xff]   ;;  %v1291_v4 = vld [vmem:[%s346_s19 + $0x8] ss:$0 sps:$4 sm:$0xff]   ;;  %1164 = vmatpush3.bf16.msra.mxu1 %v1293_v9  ;;  %v1308_v27 = vld [vmem:[#allocation2 + $0x78] sm:$0xff]   ;;  %v470_v46 = vadd.s32 4294967295, %v466_v45  ;;  %vm471_vm6 = vcmp.ge.s32.totalorder %v468_v47, 0  ;;  %s1651_s23 = scalar_lea.hbm %s1709_s8, %s1097_s24 }
  0x3f   : > { %1137 = vmatprep.mubr.msk.bf16.mxu0 %vm367_vm1, %v1290_v2  ;;  %v844_v6 = vshrl.u32 %v1290_v2, 16  ;;  %v846_v7 = vshll.u32 %v1290_v2, 16  ;;  %v850_v8 = vshll.u32 %v1291_v4, 16  ;;  %1165 = vmatprep.subr.bf16.mxu1 %v1441_v0  ;;  %v1052_v30 = vld [vmem:[%s1704_s3] ss:$0 sm:$0xff]  ;;  %vm1072_vm10 = vmpackc.low %vm1444_vm9, %vm471_vm6  ;;  %s1655_s30 = scalar_lea.sflag [#allocation4], %s335_s21 }
  0x40   : > { %1138 = vmatmul.mubr.msk.bf16.vlgmr.msra.gmra.mrb[0].mxu0 %vm367_vm1, %v1291_v4  ;;  %vm476_vm4 = vcmp.lt.s32.totalorder %v470_v46, 16  ;;  %v1307_v60 = vld [vmem:[#allocation2 + $0x80] sm:$0xff]   ;;  %v1309_v4 = vld [vmem:[#allocation2 + $0x88] sm:$0xff]   ;;  %p1721_p10 = scmp.ne.s32.totalorder %s1714_s15, 0  ;;  %s1445_s22 = smov [#allocation5]  }
  0x41   : > { %v848_v10 = vrot.slane %v846_v7, 1  ;;  %v852_v11 = vrot.slane %v850_v8, 1  ;;  %1142 = vmatpush3.bf16.msra.mxu0 %v1294_v14  ;;  %1157 = vmatprep.mubr.msk.bf16.mxu0 %vm1443_vm3, %v1441_v0  ;;  %v843_v7 = vld [vmem:[%s1708_s7] sm:$0x3]  ;;  %v1311_v14 = vld [vmem:[#allocation2 + $0x98] sm:$0xff]   ;;  %s1358_s19 = sshll.u32 %s1445_s22, 4  ;;  %s1359_s19 = int_to_ptr.vmem [resolvable:$false] %s1358_s19 }
  0x42   : > { %1166 = vmatpush3.bf16.msra.mxu1 %v1295_v15  ;;  %1143 = vmatprep.subr.bf16.mxu0 %v1441_v0  ;;  %s1360_s16 = scalar_lea.vmem %s1359_s19, 256 }
  0x43   : > { %v849_v12 = vor.u32 %v848_v10, %v844_v6  ;;  %1167 = vmatprep.subr.bf16.mxu1 %v1441_v0 }
  0x45   : > { %v853_v13 = vsel %vm518_vm2, %v849_v12, %v852_v11  ;;  %1144 = vmatpush3.bf16.msra.mxu0 %v1296_v16  ;;  %v1310_v11 = vld [vmem:[#allocation2 + $0x90] sm:$0xff]   ;;  %v862_v12 = vsel %vm860_vm12, %v843_v7, 0  ;;  %v1312_v16 = vld [vmem:[#allocation2 + $0xa0] sm:$0xff]  }
  0x46   : > { %854 = vrot.lane.b32.xlu0 %v853_v13, %s1442_s20  ;;  %1168 = vmatpush3.bf16.msra.mxu1 %v1297_v17  ;;  %v1313_v17 = vld [vmem:[#allocation2 + $0xa8] sm:$0xff]   ;;  %s1044_s20 = sshll.u32 %s335_s21, 3 }
  0x47   : > { %1145 = vmatprep.subr.bf16.mxu0 %v1441_v0  ;;  %1169 = vmatprep.subr.bf16.mxu1 %v1441_v0  ;;  %s337_s25 = scalar_lea.vmem [#allocation5], %s1044_s20 }
  0x48   : > { %s943_s11 = sshll.u32 %s337_s25, 4  ;;  %s1653_s11 = int_to_ptr.vmem [resolvable:$true] %s943_s11 }
  0x49   : > { %1146 = vmatpush3.bf16.msra.mxu0 %v1298_v18  ;;  %v1314_v18 = vld [vmem:[#allocation2 + $0xb0] sm:$0xff]   ;;  %s1354_s14 = scalar_lea.vmem %s1653_s11, 128  ;;  %p1361_p1 = scmp.lt.s32.totalorder %s1653_s11, %s1359_s19 }
  0x4a   : > { %1170 = vmatpush3.bf16.msra.mxu1 %v1299_v19  ;;  %1147 = vmatprep.subr.bf16.mxu0 %v1441_v0  ;;  %v1315_v19 = vld [vmem:[#allocation2 + $0xb8] sm:$0xff]   ;;  %p1355_p8 = scmp.ne.s32.totalorder %s1653_s11, %s1354_s14  ;;  %p1362_p3 = scmp.lt.s32.totalorder %s1360_s16, %s1354_s14 }
  0x4b   : > { %1171 = vmatprep.subr.bf16.mxu1 %v1441_v0 }
  0x4c   : > { %p1356_p11 = pnand %p1355_p8, %p1721_p10  ;;  %p1363_p5 = por %p1362_p3, %p1361_p1 }
  0x4d   : > { %1148 = vmatpush3.bf16.msra.mxu0 %v1300_v20 }
  0x4e   : > { %1172 = vmatpush3.bf16.msra.mxu1 %v1301_v21  ;;  %1149 = vmatprep.subr.bf16.mxu0 %v1441_v0  ;;  %p1357_p13 = pneg %p1356_p11 }
  0x4f   : > { %1173 = vmatprep.subr.bf16.mxu1 %v1441_v0 }
  0x50   : > { %p1364_p6 = pnand %p1363_p5, %p1357_p13 }
  0x51   : > { %1150 = vmatpush3.bf16.msra.mxu0 %v1302_v22 }
  0x52   : > { %1174 = vmatpush3.bf16.msra.mxu1 %v1303_v23  ;;  %1151 = vmatprep.subr.bf16.mxu0 %v1441_v0 }
  0x53   : > { %1175 = vmatprep.subr.bf16.mxu1 %v1441_v0 }
  0x55   : > { %1152 = vmatpush3.bf16.msra.mxu0 %v1304_v24 }
  0x56   : > { %1176 = vmatpush3.bf16.msra.mxu1 %v1305_v25  ;;  %1153 = vmatprep.subr.bf16.mxu0 %v1441_v0 }
  0x57   : > { %1181 = vmatprep.subr.bf16.mxu1 %v1441_v0 }
  0x59   : > { %1154 = vmatpush3.bf16.msra.mxu0 %v1306_v26 }
  0x5a   : > { %1155 = vmatprep.subr.bf16.mxu0 %v1441_v0 }
  0x5d   : > { %1156 = vmatpush3.bf16.msra.mxu0 %v1308_v27 }
  0x5e   : > { %1201 = vmatprep.subr.bf16.mxu0 %v1441_v0 }
  0xb8   : > { %v855_v15 = vpop.permute.xlu0 %854 }
 0x113   : > { %v1139_v29 = vpop.f32.mrb[0].mxu0 }
 0x114   : > { %v435_v31 = vmul.f32 %v1139_v29, %v1051_v28  ;;  %v412_v32 = vpop.f32.mrb[1].mxu0  ;;  %v1083_v29 = vld [vmem:[%s1706_s5] ss:$0 sm:$0xff] }
 0x115   : > { %v433_v33 = vmul.f32 %v1051_v28, %v412_v32  ;;  %v1140_v34 = vpop.f32.mrb[2].mxu0 }
 0x116   : > { %v445_v36 = vadd.f32 %v1052_v30, %v435_v31  ;;  %v415_v37 = vpop.f32.mrb[3].mxu0 }
 0x117   : > { %v443_v38 = vadd.f32 %v1052_v30, %v433_v33  ;;  %v434_v39 = vmul.f32 %v1051_v28, %v415_v37 }
 0x118   : > { %v453_v40 = vmul.f32 1.442695, %v445_v36  ;;  %vm448_vm5 = vcmp.gt.f32.partialorder %v445_v36, 0.0 }
 0x119   : > { %v449_v41 = vmul.f32 1.442695, %v443_v38  ;;  %v444_v42 = vadd.f32 %v1052_v30, %v434_v39  ;;  %vm446_vm7 = vcmp.gt.f32.partialorder %v443_v38, 0.0 }
 0x11a   : > { %1316 = vpow2.f32 %v453_v40 }
 0x11b   : > { %1318 = vpow2.f32 %v449_v41  ;;  %v451_v44 = vmul.f32 1.442695, %v444_v42  ;;  %vm447_vm8 = vcmp.gt.f32.partialorder %v444_v42, 0.0 }
 0x11d   : > { %1320 = vpow2.f32 %v451_v44 }
 0x124   : > { %v1317_v48 = vpop.eup %1316 }
 0x125   : > { %v1319_v49 = vpop.eup %1318  ;;  %v1055_v50 = vadd.f32 -1.0, %v1317_v48 }
 0x126   : > { %v1053_v51 = vadd.f32 -1.0, %v1319_v49 }
 0x127   : > { %v1321_v52 = vpop.eup %1320  ;;  %v460_v53 = vsel %vm448_vm5, %v445_v36, %v1055_v50 }
 0x128   : > { %v1054_v54 = vadd.f32 -1.0, %v1321_v52  ;;  %v458_v55 = vsel %vm446_vm7, %v443_v38, %v1053_v51  ;;  %v482_v56 = vsel %vm476_vm4, %v460_v53, 0.0 }
 0x129   : > { %v480_v57 = vsel %vm471_vm6, %v458_v55, 0.0  ;;  %v500_v58 = vpack.c.bf16 %v482_v56, %v482_v56 }
 0x12a   : > { %v459_v59 = vsel %vm447_vm8, %v444_v42, %v1054_v54 }
 0x12b   : > { %v483_v61 = vpack.c.bf16 %v459_v59, %v480_v57  ;;  %v1073_v62 = vpack.c.bf16 %v459_v59, %v458_v55  ;;  %v527_v1 = vshll.u32 %v500_v58, 16  ;;  %v731_v3 = vrot.slane %v500_v58, 1 }
 0x12d   : > { %1178 = vmatmul.mubr.msk.bf16.vlgmr.msra.gmra.mrb[0].mxu1 %vm1072_vm10, %v1073_v62  ;;  %v522_v63 = vshll.u32 %v483_v61, 16  ;;  %v730_v2 = vrot.slane %v483_v61, 1  ;;  %v520_v5 = vshrl.u32 %v483_v61, 16  ;;  %v529_v10 = vrot.slane %v527_v1, 1 }
 0x12e   : > { %1182 = vmatpush3.bf16.msra.mxu1 %v1307_v60  ;;  %1197 = vmatprep.mubr.msk.bf16.mxu1 %vm1443_vm3, %v1441_v0 }
 0x12f   : > { %1183 = vmatprep.subr.bf16.mxu1 %v1441_v0  ;;  %v524_v6 = vrot.slane %v522_v63, 1  ;;  %v732_v8 = vsel %vm729_vm11, %v730_v2, %v731_v3 }
 0x131   : > { %v525_v9 = vor.u32 %v524_v6, %v520_v5 }
 0x132   : > { %1184 = vmatpush3.bf16.msra.mxu1 %v1309_v4 }
 0x133   : > { %v530_v13 = vsel %vm518_vm2, %v525_v9, %v529_v10  ;;  %1185 = vmatprep.subr.bf16.mxu1 %v1441_v0 }
 0x134   : > { %1158 = vmatmul.mubr.bf16.vlgmr.msra.gmra.mrb[4].mxu0 %v530_v13 }
 0x135   : > { %1202 = vmatpush3.bf16.msra.mxu0 %v862_v12  ;;  %1203 = vmatprep.mubr.msk.bf16.mxu0 %vm1443_vm3, %v1441_v0 }
 0x136   : > { %1186 = vmatpush3.bf16.msra.mxu1 %v1310_v11 }
 0x137   : > { %1187 = vmatprep.subr.bf16.mxu1 %v1441_v0 }
 0x13a   : > { %1188 = vmatpush3.bf16.msra.mxu1 %v1311_v14 }
 0x13b   : > { %1189 = vmatprep.subr.bf16.mxu1 %v1441_v0 }
 0x13c   : > { %1204 = vmatmul.mubr.msk.bf16.vlgmr.msra.gmra.mrb[8].mxu0 %vm856_vm13, %v855_v15 }
 0x13e   : > { %1190 = vmatpush3.bf16.msra.mxu1 %v1312_v16 }
 0x13f   : > { %1191 = vmatprep.subr.bf16.mxu1 %v1441_v0 }
 0x142   : > { %1192 = vmatpush3.bf16.msra.mxu1 %v1313_v17 }
 0x143   : > { %1193 = vmatprep.subr.bf16.mxu1 %v1441_v0 }
 0x146   : > { %1194 = vmatpush3.bf16.msra.mxu1 %v1314_v18 }
 0x147   : > { %1195 = vmatprep.subr.bf16.mxu1 %v1441_v0  ;;  %v1084_v0 = vld [vmem:[%s1707_s6] ss:$0 sm:$0xff] }
 0x14a   : > { %1196 = vmatpush3.bf16.msra.mxu1 %v1315_v19 }
 0x14d   : > { %1198 = vmatmul.mubr.bf16.vlgmr.msra.gmra.mrb[0].mxu1 %v732_v8 }
 0x207   : > { %v614_v20 = vpop.f32.mrb[4].mxu0 }
 0x208   : > { %v1159_v21 = vpop.f32.mrb[5].mxu0 }
 0x209   : > { %v617_v22 = vpop.f32.mrb[6].mxu0 }
 0x20a   : > { %v1160_v23 = vpop.f32.mrb[7].mxu0 }
 0x20f   : > { %v898_v24 = vpop.f32.mrb[8].mxu0 }
 0x210   : > { %v1205_v25 = vpop.f32.mrb[9].mxu0 }
 0x211   : > { %v901_v26 = vpop.f32.mrb[10].mxu0 }
 0x212   : > { %v1206_v27 = vpop.f32.mrb[11].mxu0 }
 0x220   : > { %v816_v28 = vpop.f32.mrb[0].mxu1 }
 0x221   : > { %v1207_v30 = vadd.f32 %v816_v28, %v614_v20  ;;  %v1199_v31 = vpop.f32.mrb[1].mxu1 }
 0x222   : > { %v819_v32 = vpop.f32.mrb[2].mxu1 }
 0x223   : > { %v832_v33 = vmul.f32 %v1207_v30, %v1083_v29  ;;  %v1208_v34 = vadd.f32 %v819_v32, %v617_v22  ;;  %v1200_v35 = vpop.f32.mrb[3].mxu1 }
 0x225   : > { %v833_v36 = vmul.f32 %v1208_v34, %v1083_v29  ;;  %v841_v37 = vadd.f32 %v1084_v0, %v832_v33 }
 0x227   : > { %v905_v38 = vadd.f32 %v898_v24, %v841_v37  ;;  %v842_v39 = vadd.f32 %v1084_v0, %v833_v36 }
 0x229   : > { %v909_v40 = vmul.f32 1.442695, %v905_v38  ;;  %v906_v41 = vadd.f32 %v901_v26, %v842_v39  ;;  %vm907_vm14 = vcmp.gt.f32.partialorder %v905_v38, 0.0 }
 0x22b   : > { %1322 = vpow2.f32 %v909_v40  ;;  %v911_v42 = vmul.f32 1.442695, %v906_v41  ;;  %vm908_vm15 = vcmp.gt.f32.partialorder %v906_v41, 0.0 }
 0x22d   : > { %1324 = vpow2.f32 %v911_v42 }
 0x235   : > { %v1323_v43 = vpop.eup %1322 }
 0x236   : > { %v1086_v44 = vadd.f32 -1.0, %v1323_v43 }
 0x237   : > { %v1325_v45 = vpop.eup %1324 }
 0x238   : > { %v1087_v46 = vadd.f32 -1.0, %v1325_v45  ;;  %v915_v47 = vsel %vm907_vm14, %v905_v38, %v1086_v44 }
 0x23a   : > { %v916_v48 = vsel %vm908_vm15, %v906_v41, %v1087_v46 }
 0x23b   : > { %v1101_v49 = vpack.c.bf16 %v916_v48, %v915_v47 }
 0x23d   : > { %1102 = vst [vmem:[%s337_s25] sm:$0xff] %v1101_v49  }
 0x23e   : > { %1367 = shalt.err (!%p1364_p6)
}
 0x23f   : > { %s1368_s21 = scalar_lea.hbm %s1651_s23, 128  ;;  %s1372_s25 = scalar_lea.hbm %s1709_s8, 256 }
 0x240   : > { %p1369_p7 = scmp.ne.s32.totalorder %s1651_s23, %s1368_s21  ;;  %p1373_p0 = scmp.lt.u32.totalorder %s1651_s23, %s1709_s8 }
 0x241   : > { %p1374_p2 = scmp.lt.u32.totalorder %s1372_s25, %s1368_s21  ;;  %p1376_p8 = scmp.lt.u32.totalorder %s1368_s21, %s1651_s23 }
 0x242   : > { %p1370_p9 = pnand %p1369_p7, %p1721_p10 }
 0x243   : > { %p1375_p4 = por %p1374_p2, %p1373_p0 }
 0x244   : > { %p1371_p12 = pneg %p1370_p9 }
 0x245   : > { %p1377_p11 = por %p1376_p8, %p1375_p4 }
 0x247   : > { %p1378_p13 = pnand %p1377_p11, %p1371_p12 }
 0x249   : > { %1381 = shalt.err (!%p1378_p13)
}
 0x24a   : > { %s1446_s14 = smov 64   ;;  %s1447_s22 = smov 4  }
 0x24b   : > { %1219 = dma.vmem_to_hbm [thread:$0]  (%p1721_p10), %s1653_s11, 128, %s1651_s23, %s1655_s30, %s1446_s14, %s1446_s14, %s1447_s22  }
 0x24c PF: > { %p1231_p1 = scmp.ge.s32.totalorder %s1436_s10, 2  ;;  %s958_s19 = sand.u32 1, %s1416_s27  }
 0x24d   : > { %p1722_p3 = scmp.ne.s32.totalorder %s1715_s17, 0  ;;  %s959_s16 = scalar_lea.sflag [#allocation4], %s958_s19 }
 0x24f   : > { %p1226_p5 = pnand %p1231_p1, %p1722_p3 }
 0x251   : > { %1411 = dma.done.wait (!%p1226_p5), %s959_s16, 128  }
 0x252   : > { %1413 = vsyncadd (!%p1226_p5), %s959_s16, 4294967168  ;;  %s22_s10 = sadd.s32 1, %s1436_s10   ;;  %s1723_s27 = smov %s1420_s28 }
 0x253   : > { %p19_p6 = scmp.ge.s32.totalorder %s22_s10, 4   ;;  %s1724_s28 = smov %s1424_s29 }
 0x254   : > { %s1725_s29 = smov %s1546_s18  ;;  %s1726_s30 = smov %s1432_s9 }
 0x255   : > { %s1727_s9 = smov %s1729_s13  ;;  %21 = sbr.rel (!%p19_p6) target bundleno = 5 (0x5), region = 94 }
 0x25c   :  { %964 = vsyncpa [#allocation3], 1 }
 0x25d   :  { %966 = vsyncpa [#allocation3 + $0x1], 1 }
 0x25e   :  { %967 = vsyncpa [#allocation4], 1 }
 0x25f   :  { %969 = vsyncpa [#allocation4 + $0x1], 1 }

</bundles_post_ra>
